<compile_context>
chip_gen: v7x
topology: tpu7x:2x2x1
jax: 0.10.0
libtpu: 0.0.40
codegen_flags: <defaults>
</compile_context>

<pallas_src>
import functools
import math

import jax
import jax.numpy as jnp
from jax.experimental import pallas as pl
from jax.experimental.pallas import tpu as pltpu

_LANE = 128
_INV_SQRT2 = 1.0 / math.sqrt(2.0)


def _round_up(a: int, b: int) -> int:
    return (a + b - 1) // b * b


def _sublane_pack(dtype) -> int:
    # 8 for f32, 16 for bf16, 32 for int8/fp8 — packed-vreg sublane count.
    return max(8, 32 // max(jnp.dtype(dtype).itemsize, 1))


@functools.lru_cache(maxsize=1)
def _tpu_hw():
    """(preferred_tm, vmem_budget_bytes, vmem_capacity_bytes), generation-aware."""
    vmem_cap = None
    try:
        info = pltpu.get_tpu_info()
        for attr in ("vmem_capacity_bytes", "vmem_size_bytes", "vmem_bytes"):
            v = getattr(info, attr, None)
            if v:
                vmem_cap = int(v)
                break
    except Exception:
        vmem_cap = None
    kind = ""
    try:
        kind = jax.devices()[0].device_kind.lower().replace(" ", "")
    except Exception:
        pass
    if vmem_cap is None:
        # v7x has 64 MiB VMEM per TensorCore; v5e/v6e have 128 MiB.
        vmem_cap = 64 * 1024 * 1024 if "7" in kind else 128 * 1024 * 1024
    if vmem_cap <= 64 * 1024 * 1024:
        budget = vmem_cap - 14 * 1024 * 1024          # ~50 MiB usable on v7x
    else:
        budget = vmem_cap - 20 * 1024 * 1024          # ~108 MiB usable on v5e/v6e
    if ("v6" in kind) or ("7" in kind):
        preferred_tm = 512     # 2x256x256 MXU: long vmatmul runs, fewer grid steps
    else:
        preferred_tm = 256     # v5e (4x128x128) & fallback: 128-256 rows suffice
    return preferred_tm, budget, vmem_cap


# ---------------------------------------------------------------------------
# Kernels
# ---------------------------------------------------------------------------

def _mlp_kernel_resident(x_ref, w1_ref, b1_ref, w2_ref, b2_ref, o_ref):
    # x: (tm, Dp)  W1: (Dp, Hp)  b1: (1, Hp) f32  W2: (Hp, Dp)  b2: (1, Dp) f32
    h = jnp.dot(x_ref[...], w1_ref[...], preferred_element_type=jnp.float32)
    h = h + b1_ref[...]
    # Exact GELU (erf formulation) in f32 — matches PyTorch nn.GELU default.
    h = 0.5 * h * (1.0 + jax.lax.erf(h * _INV_SQRT2))
    o = jnp.dot(h.astype(w2_ref.dtype), w2_ref[...],
                preferred_element_type=jnp.float32)
    o_ref[...] = (o + b2_ref[...]).astype(o_ref.dtype)


def _mlp_kernel_htiled(x_ref, w1_ref, b1_ref, w2_ref, b2_ref, o_ref, acc_ref):
    # Streams W1/W2 in H-chunks: x:(tm,Dp) W1:(Dp,th) b1:(1,th) W2:(th,Dp)
    # b2:(1,Dp) acc:(tm,Dp) f32.  Grid axis 1 runs over H chunks ("arbitrary").
    k = pl.program_id(1)

    @pl.when(k == 0)
    def _():
        acc_ref[...] = jnp.zeros_like(acc_ref)

    h = jnp.dot(x_ref[...], w1_ref[...], preferred_element_type=jnp.float32)
    h = h + b1_ref[...]
    h = 0.5 * h * (1.0 + jax.lax.erf(h * _INV_SQRT2))
    acc_ref[...] += jnp.dot(h.astype(w2_ref.dtype), w2_ref[...],
                            preferred_element_type=jnp.float32)

    @pl.when(k == pl.num_programs(1) - 1)
    def _():
        o_ref[...] = (acc_ref[...] + b2_ref[...]).astype(o_ref.dtype)


# ---------------------------------------------------------------------------
# Wrapper
# ---------------------------------------------------------------------------

def prepare_mlp_params(w1, b1, w2, b2):
    """Pad W1/W2 to lane-dense (multiple-of-128) shapes and pre-cast biases to
    f32.  Call ONCE per parameter set (outside the per-call hot path) — weights
    are static across calls, so the pad copy must not repeat every forward."""
    d, h = w1.shape
    d_pad = _round_up(d, _LANE)
    h_pad = _round_up(h, _LANE)
    if (d_pad, h_pad) == (d, h):
        w1p, w2p = w1, w2
        b1p = b1.astype(jnp.float32).reshape(1, h_pad)
        b2p = b2.astype(jnp.float32).reshape(1, d_pad)
    else:
        w1p = jnp.zeros((d_pad, h_pad), w1.dtype).at[:d, :h].set(w1)
        w2p = jnp.zeros((h_pad, d_pad), w2.dtype).at[:h, :d].set(w2)
        b1p = jnp.zeros((1, h_pad), jnp.float32).at[0, :h].set(
            b1.astype(jnp.float32))
        b2p = jnp.zeros((1, d_pad), jnp.float32).at[0, :d].set(
            b2.astype(jnp.float32))
    return (w1p, b1p, w2p, b2p)


@functools.partial(jax.jit, static_argnames=("mode", "tm", "th"))
def _mlp_apply(x, w1p, b1p, w2p, b2p, *, mode=None, tm=None, th=None):
    orig_shape = x.shape
    d = orig_shape[-1]
    x2 = x.reshape(-1, d)
    m = x2.shape[0]
    d_pad, h_pad = w1p.shape
    dtype = x.dtype
    pack = _sublane_pack(dtype)
    xbytes = jnp.dtype(dtype).itemsize
    wbytes = jnp.dtype(w1p.dtype).itemsize

    preferred_tm, budget, vmem_cap = _tpu_hw()

    # M rounded only to the sublane pack; the last grid block may be ragged.
    m_pad = _round_up(m, pack)

    if tm is None:
        if m_pad <= preferred_tm:
            # Keep >= 2 grid steps: double-buffers x/out and lets the M axis
            # shard across v7x's two TensorCores.
            tm = max(pack, _round_up(pl.cdiv(m_pad, 2), pack))
        else:
            tm = preferred_tm
    else:
        tm = max(pack, _round_up(int(tm), pack))
    tm = min(tm, m_pad)
    tm_floor = max(128, pack) if m_pad >= 128 else pack

    def resident_bytes(tm_):
        return (2 * d_pad * h_pad * wbytes            # W1 + W2 (single-buffered)
                + (h_pad + d_pad) * 4                 # f32 biases
                + 4 * tm_ * d_pad * xbytes            # x / out tiles (double-buf)
                + tm_ * h_pad * 4                     # f32 (tm, H) intermediate
                + tm_ * d_pad * 4)                    # f32 (tm, D) intermediate

    def h_tiled_bytes(tm_, th_):
        return (2 * (2 * th_ * d_pad) * wbytes        # W1/W2 chunks (double-buf)
                + 2 * (th_ + d_pad) * 4               # bias chunks
                + 4 * tm_ * d_pad * xbytes            # x / out tiles
                + tm_ * th_ * 4                       # f32 (tm, th) intermediate
                + 2 * tm_ * d_pad * 4)                # f32 accumulator + out tmp

    if mode is None:
        sel = None
        tm_try = tm
        while True:
            if resident_bytes(tm_try) <= budget:
                sel, tm = "resident", tm_try
                break
            if tm_try <= tm_floor:
                break
            tm_try = max(tm_floor, tm_try // 2)
        mode = sel if sel is not None else "h_tiled"

    if mode == "h_tiled":
        if th is None or (h_pad % th) != 0:
            th = 128
            for cand in (2048, 1024, 512, 256, 128):
                if h_pad % cand == 0 and h_tiled_bytes(tm, cand) <= budget:
                    th = cand
                    break
        while h_tiled_bytes(tm, th) > budget and tm > tm_floor:
            tm = max(tm_floor, tm // 2)
        footprint = h_tiled_bytes(tm, th)
    else:
        footprint = resident_bytes(tm)

    grid_m = pl.cdiv(m_pad, tm)

    # Pad activations only if actually needed (no copy when already aligned).
    if m_pad != m or d_pad != d:
        x2p = jnp.zeros((m_pad, d_pad), dtype).at[:m, :d].set(x2)
    else:
        x2p = x2

    vmem_limit = int(min(max(2 * footprint, 32 * 1024 * 1024),
                         vmem_cap - 2 * 1024 * 1024))

    weight_bytes = 2 * d_pad * h_pad * wbytes + (h_pad + d_pad) * 4
    if mode == "h_tiled":
        weight_bytes *= grid_m   # weights are re-streamed once per row tile
    cost = pl.CostEstimate(
        flops=4 * m_pad * d_pad * h_pad,
        transcendentals=m_pad * h_pad,
        bytes_accessed=int(2 * m_pad * d_pad * xbytes + weight_bytes),
    )

    if mode == "resident":
        weight_mode = pl.Buffered(1)   # grid-invariant blocks: no 2nd buffer
        out = pl.pallas_call(
            _mlp_kernel_resident,
            out_shape=jax.ShapeDtypeStruct((m_pad, d_pad), dtype),
            grid_spec=pltpu.PrefetchScalarGridSpec(
                num_scalar_prefetch=0,
                grid=(grid_m,),
                in_specs=[
                    pl.BlockSpec((tm, d_pad), lambda i: (i, 0)),          # x
                    pl.BlockSpec((d_pad, h_pad), lambda i: (0, 0),
                                 pipeline_mode=weight_mode),              # W1
                    pl.BlockSpec((1, h_pad), lambda i: (0, 0),
                                 pipeline_mode=weight_mode),              # b1
                    pl.BlockSpec((h_pad, d_pad), lambda i: (0, 0),
                                 pipeline_mode=weight_mode),              # W2
                    pl.BlockSpec((1, d_pad), lambda i: (0, 0),
                                 pipeline_mode=weight_mode),              # b2
                ],
                out_specs=pl.BlockSpec((tm, d_pad), lambda i: (i, 0)),
            ),
            compiler_params=pltpu.CompilerParams(
                dimension_semantics=("parallel",),
                vmem_limit_bytes=vmem_limit,
            ),
            cost_estimate=cost,
        )(x2p, w1p, b1p, w2p, b2p)
    else:
        out = pl.pallas_call(
            _mlp_kernel_htiled,
            out_shape=jax.ShapeDtypeStruct((m_pad, d_pad), dtype),
            grid_spec=pltpu.PrefetchScalarGridSpec(
                num_scalar_prefetch=0,
                grid=(grid_m, h_pad // th),
                in_specs=[
                    pl.BlockSpec((tm, d_pad), lambda i, k: (i, 0)),       # x
                    pl.BlockSpec((d_pad, th), lambda i, k: (0, k)),       # W1 chunk
                    pl.BlockSpec((1, th), lambda i, k: (0, k)),           # b1 chunk
                    pl.BlockSpec((th, d_pad), lambda i, k: (k, 0)),       # W2 chunk
                    pl.BlockSpec((1, d_pad), lambda i, k: (0, 0),
                                 pipeline_mode=pl.Buffered(1)),           # b2
                ],
                out_specs=pl.BlockSpec((tm, d_pad), lambda i, k: (i, 0)),
                scratch_shapes=[pltpu.VMEM((tm, d_pad), jnp.float32)],
            ),
            compiler_params=pltpu.CompilerParams(
                dimension_semantics=("parallel", "arbitrary"),
                vmem_limit_bytes=vmem_limit,
            ),
            cost_estimate=cost,
        )(x2p, w1p, b1p, w2p, b2p)

    return out[:m, :d].reshape(orig_shape)


class MLPBlockKernel:
    """Weight-stationary wrapper: pads parameters once at construction so the
    per-call hot path does no weight/bias copies."""

    def __init__(self, w1, b1, w2, b2):
        self._params = prepare_mlp_params(w1, b1, w2, b2)

    def __call__(self, x, *, mode=None, tm=None, th=None):
        return _mlp_apply(x, *self._params, mode=mode, tm=tm, th=th)


def mlp_block(x, w1, b1, w2, b2, *, mode=None, tm=None, th=None):
    """Functional convenience form.  Re-pads parameters on each call; prefer
    MLPBlockKernel for repeated calls with the same parameters."""
    params = prepare_mlp_params(w1, b1, w2, b2)
    return _mlp_apply(x, *params, mode=mode, tm=tm, th=th)


def _ref_mlp(x, w1, b1, w2, b2):
    x32 = x.astype(jnp.float32)
    h = x32 @ w1.astype(jnp.float32) + b1.astype(jnp.float32)
    h = 0.5 * h * (1.0 + jax.lax.erf(h * _INV_SQRT2))
    return h @ w2.astype(jnp.float32) + b2.astype(jnp.float32)


if __name__ == "__main__":
    key = jax.random.PRNGKey(0)

    def make_case(k, batch, seq, d, hdim, dtype):
        kx, kw1, kb1, kw2, kb2 = jax.random.split(k, 5)
        x = jax.random.normal(kx, (batch, seq, d), jnp.float32).astype(dtype)
        w1 = (jax.random.normal(kw1, (d, hdim), jnp.float32)
              / math.sqrt(d)).astype(dtype)
        b1 = (jax.random.normal(kb1, (hdim,), jnp.float32) * 0.01).astype(dtype)
        w2 = (jax.random.normal(kw2, (hdim, d), jnp.float32)
              / math.sqrt(hdim)).astype(dtype)
        b2 = (jax.random.normal(kb2, (d,), jnp.float32) * 0.01).astype(dtype)
        return x, w1, b1, w2, b2

    k1, k2, k3 = jax.random.split(key, 3)

    # Case 1: toy module shapes (D/H padded up to 128 lanes), resident path.
    x, w1, b1, w2, b2 = make_case(k1, 2, 8, 32, 64, jnp.float32)
    blk = MLPBlockKernel(w1, b1, w2, b2)
    out = jax.block_until_ready(blk(x))
    ref = _ref_mlp(x, w1, b1, w2, b2)
    assert out.shape == x.shape
    assert jnp.allclose(out, ref, atol=1e-4, rtol=1e-4), "case1 mismatch"

    # Case 2: lane-dense dims, M not a multiple of tm (ragged last block).
    args = make_case(k2, 3, 70, 128, 256, jnp.float32)
    blk2 = MLPBlockKernel(*args[1:])
    out = jax.block_until_ready(blk2(args[0]))
    ref = _ref_mlp(*args)
    assert jnp.allclose(out, ref, atol=2e-3, rtol=2e-3), "case2 mismatch"

    # Case 2b: forced H-chunked streaming path (the v7x escape hatch).
    out = jax.block_until_ready(blk2(args[0], mode="h_tiled", th=128))
    assert jnp.allclose(out, ref, atol=2e-3, rtol=2e-3), "case2b mismatch"

    # Case 3: bf16 fast path (native bf16 MXU operands, f32 accumulation).
    args = make_case(k3, 2, 64, 128, 256, jnp.bfloat16)
    out = jax.block_until_ready(mlp_block(*args))
    ref = _ref_mlp(*args)
    assert jnp.allclose(out.astype(jnp.float32), ref,
                        atol=0.15, rtol=0.15), "case3 mismatch"

    print("KERNEL_OK")
</pallas_src>

<mosaic_0001>
module attributes {stable_mosaic.version = 11 : i64} {
  func.func @_mlp_kernel_resident(%arg0: i32, %arg1: memref<8x128xf32, #tpu.memory_space<vmem>>, %arg2: memref<128x128xf32, #tpu.memory_space<vmem>>, %arg3: memref<1x128xf32, #tpu.memory_space<vmem>>, %arg4: memref<128x128xf32, #tpu.memory_space<vmem>>, %arg5: memref<1x128xf32, #tpu.memory_space<vmem>>, %arg6: memref<8x128xf32, #tpu.memory_space<vmem>>) attributes {dimension_semantics = [#tpu.dimension_semantics<parallel>], iteration_bounds = array<i64: 2>, scalar_prefetch = 0 : i64, scratch_operands = 0 : i64, tpu.core_type = #tpu.core_type<tc>, window_params = [{transform_indices = @transform_0, window_bounds = array<i64: 8, 128>}, {pipeline_mode = #tpu.pipeline_mode<synchronous>, transform_indices = @transform_1, window_bounds = array<i64: 128, 128>}, {pipeline_mode = #tpu.pipeline_mode<synchronous>, transform_indices = @transform_2, window_bounds = array<i64: 1, 128>}, {pipeline_mode = #tpu.pipeline_mode<synchronous>, transform_indices = @transform_3, window_bounds = array<i64: 128, 128>}, {pipeline_mode = #tpu.pipeline_mode<synchronous>, transform_indices = @transform_4, window_bounds = array<i64: 1, 128>}, {transform_indices = @transform_5, window_bounds = array<i64: 8, 128>}]} {
    %c0 = arith.constant 0 : index
    %c0_0 = arith.constant 0 : index
    %0 = vector.load %arg1[%c0, %c0_0] : memref<8x128xf32, #tpu.memory_space<vmem>>, vector<8x128xf32>
    %c0_1 = arith.constant 0 : index
    %c0_2 = arith.constant 0 : index
    %1 = vector.load %arg2[%c0_1, %c0_2] : memref<128x128xf32, #tpu.memory_space<vmem>>, vector<128x128xf32>
    %cst = arith.constant dense<0.000000e+00> : vector<8x128xf32>
    %2 = tpu.matmul %0, %1, %cst {dimension_numbers = #tpu.dot_dimension_numbers<[1], [0], [0], [1], [0, 0, 1, 1], [], []>} : vector<8x128xf32>, vector<128x128xf32>, vector<8x128xf32> -> vector<8x128xf32>
    %c0_3 = arith.constant 0 : index
    %c0_4 = arith.constant 0 : index
    %3 = vector.load %arg3[%c0_3, %c0_4] : memref<1x128xf32, #tpu.memory_space<vmem>>, vector<1x128xf32>
    %4 = vector.broadcast %3 : vector<1x128xf32> to vector<8x128xf32>
    %5 = arith.addf %2, %4 : vector<8x128xf32>
    %cst_5 = arith.constant 5.000000e-01 : f32
    %6 = vector.broadcast %cst_5 : f32 to vector<8x128xf32>
    %7 = arith.mulf %6, %5 : vector<8x128xf32>
    %cst_6 = arith.constant 0.707106769 : f32
    %8 = vector.broadcast %cst_6 : f32 to vector<8x128xf32>
    %9 = arith.mulf %5, %8 : vector<8x128xf32>
    %10 = math.erf %9 : vector<8x128xf32>
    %cst_7 = arith.constant 1.000000e+00 : f32
    %11 = vector.broadcast %cst_7 : f32 to vector<8x128xf32>
    %12 = arith.addf %11, %10 : vector<8x128xf32>
    %13 = arith.mulf %7, %12 : vector<8x128xf32>
    %c0_8 = arith.constant 0 : index
    %c0_9 = arith.constant 0 : index
    %14 = vector.load %arg4[%c0_8, %c0_9] : memref<128x128xf32, #tpu.memory_space<vmem>>, vector<128x128xf32>
    %cst_10 = arith.constant dense<0.000000e+00> : vector<8x128xf32>
    %15 = tpu.matmul %13, %14, %cst_10 {dimension_numbers = #tpu.dot_dimension_numbers<[1], [0], [0], [1], [0, 0, 1, 1], [], []>} : vector<8x128xf32>, vector<128x128xf32>, vector<8x128xf32> -> vector<8x128xf32>
    %c0_11 = arith.constant 0 : index
    %c0_12 = arith.constant 0 : index
    %16 = vector.load %arg5[%c0_11, %c0_12] : memref<1x128xf32, #tpu.memory_space<vmem>>, vector<1x128xf32>
    %17 = vector.broadcast %16 : vector<1x128xf32> to vector<8x128xf32>
    %18 = arith.addf %15, %17 : vector<8x128xf32>
    %c0_13 = arith.constant 0 : index
    %c0_14 = arith.constant 0 : index
    %19 = vector.load %arg6[%c0_13, %c0_14] : memref<8x128xf32, #tpu.memory_space<vmem>>, vector<8x128xf32>
    tpu.vector_store %arg6[%c0_13, %c0_14], %18 {strides = array<i32>} : memref<8x128xf32, #tpu.memory_space<vmem>>, vector<8x128xf32>,
    return
  }
  func.func @transform_0(%arg0: i32) -> (i32, i32) {
    %c0_i32 = arith.constant 0 : i32
    %c0_i32_0 = arith.constant 0 : i32
    return %arg0, %c0_i32 : i32, i32
  }
  func.func @transform_1(%arg0: i32) -> (i32, i32) {
    %c0_i32 = arith.constant 0 : i32
    %c0_i32_0 = arith.constant 0 : i32
    %c0_i32_1 = arith.constant 0 : i32
    return %c0_i32, %c0_i32_0 : i32, i32
  }
  func.func @transform_2(%arg0: i32) -> (i32, i32) {
    %c0_i32 = arith.constant 0 : i32
    %c0_i32_0 = arith.constant 0 : i32
    %c0_i32_1 = arith.constant 0 : i32
    return %c0_i32, %c0_i32_0 : i32, i32
  }
  func.func @transform_3(%arg0: i32) -> (i32, i32) {
    %c0_i32 = arith.constant 0 : i32
    %c0_i32_0 = arith.constant 0 : i32
    %c0_i32_1 = arith.constant 0 : i32
    return %c0_i32, %c0_i32_0 : i32, i32
  }
  func.func @transform_4(%arg0: i32) -> (i32, i32) {
    %c0_i32 = arith.constant 0 : i32
    %c0_i32_0 = arith.constant 0 : i32
    %c0_i32_1 = arith.constant 0 : i32
    return %c0_i32, %c0_i32_0 : i32, i32
  }
  func.func @transform_5(%arg0: i32) -> (i32, i32) {
    %c0_i32 = arith.constant 0 : i32
    %c0_i32_0 = arith.constant 0 : i32
    return %arg0, %c0_i32 : i32, i32
  }
}

</mosaic_0001>

<bundles_post_ra>
// kernel: _mlp_apply.1
= control target key start
LH: loop header
LB: loop body
LE: loop exit
PB: predicated region body
PF: predicated region fallthrough
CT: control target
= control target key end

     0   :  { %10 = vsyncpa [#allocation3], 0  ;;  %s952_s0 = inlined_call_operand.vmem [shape: f32[16,128], index: 0, kind: input, shape index: {}]   ;;  %s953_s1 = inlined_call_operand.hbm [shape: f32[128,128], index: 1, kind: input, shape index: {}]   ;;  %s954_s2 = inlined_call_operand.vmem [shape: f32[1,128], index: 2, kind: input, shape index: {}]   ;;  %s955_s3 = inlined_call_operand.hbm [shape: f32[128,128], index: 3, kind: input, shape index: {}]   ;;  %s956_s4 = inlined_call_operand.vmem [shape: f32[1,128], index: 4, kind: input, shape index: {}]   ;;  %s957_s5 = inlined_call_operand.vmem [shape: f32[16,128], index: 5, kind: output, shape index: {}]  }
   0x1   :  { %11 = vsyncpa [#allocation5], 0  ;;  %s830_s18 = smov 0  }
   0x2 LB: > { %s836_s19 = sadd.s32 4294967295, %s791_s18   ;;  %p520_p0 = scmp.ge.s32.totalorder %s791_s18, 1  ;;  %s791_s18 = sphi %s830_s18, %s17_s18  }
   0x3   : > { %p158_p1 = scmp.lt.s32.totalorder %s791_s18, 3  ;;  %s793_s20 = smov [#allocation2]  }
   0x4   : > { %s170_s21 = sshll.u32 %s793_s20, 4  ;;  %p958_p3 = scmp.eq.s32.totalorder %s836_s19, 0  ;;  %s171_s21 = int_to_ptr.vmem [resolvable:$true] %s170_s21 }
   0x5   : > { %p840_p2 = pnand %p520_p0, %p158_p1  ;;  %s794_s23 = smov [#allocation4]  }
   0x6   : > { %s186_s24 = sshll.u32 %s794_s23, 4  ;;  %s721_s28 = scalar_lea.hbm %s953_s1, 2048  ;;  %s853_s24 = int_to_ptr.vmem [resolvable:$true] %s186_s24 }
   0x7   : > { %s960_s22 = scalar_select %p840_p2, 1, 0 }
   0x8   : > { %p693_p4 = pneg %p840_p2  ;;  %p722_p6 = scmp.ne.s32.totalorder %s953_s1, %s721_s28 }
   0x9   : > { %p728_p10 = scmp.lt.u32.totalorder %s721_s28, %s953_s1 }
   0xa   : > { %p849_p5 = pnand %p958_p3, %p693_p4 }
   0xc   : > { %p723_p7 = pneg %p849_p5 }
   0xe   : > { %p724_p8 = pnand %p723_p7, %p722_p6 }
  0x10   : > { %p725_p9 = pneg %p724_p8 }
  0x12   : > { %p730_p11 = pnand %p728_p10, %p725_p9 }
  0x14   : > { %733 = shalt.err (!%p730_p11)
}
  0x15   : > { %s734_s8 = scalar_lea.vmem %s171_s21, 2048  ;;  %p742_p1 = scmp.lt.s32.totalorder %s171_s21, %s171_s21 }
  0x16   : > { %p735_p12 = scmp.ne.s32.totalorder %s171_s21, %s734_s8  ;;  %p743_p4 = scmp.lt.s32.totalorder %s734_s8, %s734_s8 }
  0x18   : > { %p737_p13 = pnand %p735_p12, %p723_p7  ;;  %p744_p3 = por %p743_p4, %p742_p1 }
  0x1a   : > { %p738_p0 = pneg %p737_p13 }
  0x1c   : > { %p745_p2 = pnand %p744_p3, %p738_p0 }
  0x1e   : > { %748 = shalt.err (!%p745_p2)
}
  0x1f   : > { %s795_s9 = smov 128   ;;  %s796_s10 = smov 8  }
  0x20   : > { %696 = dma.hbm_to_vmem [thread:$0]  (!%p849_p5), %s953_s1, 2048, %s171_s21, [#allocation3], %s795_s9, %s795_s9, %s796_s10  }
  0x21   : > { %s749_s15 = scalar_lea.hbm %s955_s3, 2048 }
  0x22   : > { %p750_p6 = scmp.ne.s32.totalorder %s955_s3, %s749_s15  ;;  %p756_p8 = scmp.lt.u32.totalorder %s749_s15, %s955_s3 }
  0x24   : > { %p752_p2 = pnand %p750_p6, %p723_p7 }
  0x26   : > { %p753_p3 = pneg %p752_p2 }
  0x28   : > { %p758_p9 = pnand %p756_p8, %p753_p3 }
  0x2a   : > { %761 = shalt.err (!%p758_p9)
}
  0x2b   : > { %s762_s21 = scalar_lea.vmem %s853_s24, 2048  ;;  %p770_p13 = scmp.lt.s32.totalorder %s853_s24, %s853_s24 }
  0x2c   : > { %p763_p10 = scmp.ne.s32.totalorder %s853_s24, %s762_s21  ;;  %p771_p0 = scmp.lt.s32.totalorder %s762_s21, %s762_s21 }
  0x2e   : > { %p765_p11 = pnand %p763_p10, %p723_p7  ;;  %p772_p1 = por %p771_p0, %p770_p13 }
  0x30   : > { %p766_p12 = pneg %p765_p11 }
  0x32   : > { %p773_p4 = pnand %p772_p1, %p766_p12 }
  0x34   : > { %776 = shalt.err (!%p773_p4)
}
  0x35   : > { %699 = dma.hbm_to_vmem [thread:$0]  (!%p849_p5), %s955_s3, 2048, %s853_s24, [#allocation5], %s795_s9, %s795_s9, %s796_s10  }
  0x36   : > { %p962_p6 = scmp.ne.s32.totalorder %s960_s22, 0 }
  0x37   : > { %p963_p2 = scmp.eq.s32.totalorder (!%p962_p6), %s836_s19, 0 }
  0x38   : > { %212 = sbr.rel (%p962_p6) target bundleno = 547 (0x223), region = 40 }
  0x3f   : > { %782 = dma.done.wait (%p963_p2), [#allocation3], 2048   ;;  %p964_p7 = pmov %p963_p2 }
  0x40   : > { %p965_p3 = pmov %p963_p2 }
  0x41   : > { %784 = vsyncadd (%p964_p7), [#allocation3], 4294965248 }
  0x42   : > { %786 = dma.done.wait (%p965_p3), [#allocation5], 2048   ;;  %p966_p8 = pmov %p963_p2 }
  0x43   : > { %v797_v0 = vmov 0.0|0.0   ;;  %vm798_vm0 = vmmov 0   ;;  %v799_v1 = vmov 0.0   ;;  %v251_v2 = vld [vmem:[#allocation2] sm:$0xff]  ;;  %v252_v3 = vld [vmem:[#allocation2 + $0x8] sm:$0xff]  ;;  %v253_v4 = vld [vmem:[#allocation2 + $0x10] sm:$0xff] }
  0x44   : > { %788 = vsyncadd (%p966_p8), [#allocation5], 4294965248  ;;  %637 = vmatprep.subr.bf16.mxu0 %v797_v0  ;;  %599 = vmatprep.mubr.msk.f32.mxu0 %vm798_vm0, %v799_v1  ;;  %v638_v5 = vpack.c.bf16 %v252_v3, %v251_v2  ;;  %v254_v6 = vld [vmem:[#allocation2 + $0x18] sm:$0xff]  ;;  %v255_v8 = vld [vmem:[#allocation2 + $0x20] sm:$0xff]  ;;  %p242_p5 = scmp.lt.s32.totalorder %s836_s19, 1 }
  0x45   : > { %661 = vmatprep.subr.bf16.mxu1 %v797_v0  ;;  %634 = vmatprep.mubr.msk.f32.mxu1 %vm798_vm0, %v799_v1  ;;  %v641_v7 = vpack.c.bf16 %v254_v6, %v253_v4  ;;  %v256_v9 = vld [vmem:[#allocation2 + $0x28] sm:$0xff]  ;;  %v349_v10 = vld [vmem:[#allocation4] sm:$0xff]  ;;  %v351_v12 = vld [vmem:[#allocation4 + $0x10] sm:$0xff] }
  0x46   : > { %639 = vmatpush3.bf16.msra.mxu0 %v638_v5  ;;  %v350_v11 = vld [vmem:[#allocation4 + $0x8] sm:$0xff]  ;;  %v352_v13 = vld [vmem:[#allocation4 + $0x18] sm:$0xff]  ;;  %v644_v14 = vpack.c.bf16 %v256_v9, %v255_v8  ;;  %v257_v16 = vld [vmem:[#allocation2 + $0x30] sm:$0xff]  ;;  %s968_s19 = smov (!%p242_p5, %s836_s19), 1 }
  0x47   : > { %640 = vmatprep.subr.bf16.mxu0 %v797_v0  ;;  %v662_v15 = vpack.c.bf16 %v350_v11, %v349_v10  ;;  %v258_v17 = vld [vmem:[#allocation2 + $0x38] sm:$0xff]  ;;  %v665_v18 = vpack.c.bf16 %v352_v13, %v351_v12  ;;  %v353_v19 = vld [vmem:[#allocation4 + $0x20] sm:$0xff]  ;;  %v354_v20 = vld [vmem:[#allocation4 + $0x28] sm:$0xff]  ;;  %s527_s22 = sshll.u32 %s968_s19, 3 }
  0x48   : > { %v647_v21 = vpack.c.bf16 %v258_v17, %v257_v16  ;;  %v259_v22 = vld [vmem:[#allocation2 + $0x40] sm:$0xff]  ;;  %v260_v23 = vld [vmem:[#allocation2 + $0x48] sm:$0xff]  ;;  %v668_v24 = vpack.c.bf16 %v354_v20, %v353_v19  ;;  %v261_v26 = vld [vmem:[#allocation2 + $0x50] sm:$0xff]  ;;  %s245_s28 = scalar_lea.vmem %s952_s0, %s527_s22  ;;  %s249_s10 = scalar_lea.vmem %s957_s5, %s527_s22 }
  0x49   : > { %663 = vmatpush3.bf16.msra.mxu1 %v662_v15  ;;  %v650_v25 = vpack.c.bf16 %v260_v23, %v259_v22  ;;  %v262_v27 = vld [vmem:[#allocation2 + $0x58] sm:$0xff]  ;;  %v263_v29 = vld [vmem:[#allocation2 + $0x60] sm:$0xff]  ;;  %v264_v30 = vld [vmem:[#allocation2 + $0x68] sm:$0xff] }
  0x4a   : > { %642 = vmatpush3.bf16.msra.mxu0 %v641_v7  ;;  %664 = vmatprep.subr.bf16.mxu1 %v797_v0  ;;  %v653_v28 = vpack.c.bf16 %v262_v27, %v261_v26  ;;  %v656_v31 = vpack.c.bf16 %v264_v30, %v263_v29  ;;  %v265_v32 = vld [vmem:[#allocation2 + $0x70] sm:$0xff]  ;;  %v266_v33 = vld [vmem:[#allocation2 + $0x78] sm:$0xff]  ;;  %v250_v35 = vld [vmem:[%s245_s28] sm:$0xff] }
  0x4b   : > { %643 = vmatprep.subr.bf16.mxu0 %v797_v0  ;;  %v659_v34 = vpack.c.bf16 %v266_v33, %v265_v32  ;;  %v355_v36 = vld [vmem:[#allocation4 + $0x30] sm:$0xff]  ;;  %v356_v37 = vld [vmem:[#allocation4 + $0x38] sm:$0xff]  ;;  %v357_v39 = vld [vmem:[#allocation4 + $0x40] sm:$0xff] }
  0x4c   : > { %v671_v38 = vpack.c.bf16 %v356_v37, %v355_v36  ;;  %v358_v40 = vld [vmem:[#allocation4 + $0x48] sm:$0xff]  ;;  %v359_v42 = vld [vmem:[#allocation4 + $0x50] sm:$0xff]  ;;  %v360_v43 = vld [vmem:[#allocation4 + $0x58] sm:$0xff] }
  0x4d   : > { %666 = vmatpush3.bf16.msra.mxu1 %v665_v18  ;;  %v674_v41 = vpack.c.bf16 %v358_v40, %v357_v39  ;;  %v677_v44 = vpack.c.bf16 %v360_v43, %v359_v42  ;;  %v361_v45 = vld [vmem:[#allocation4 + $0x60] sm:$0xff]  ;;  %v362_v46 = vld [vmem:[#allocation4 + $0x68] sm:$0xff]  ;;  %v363_v48 = vld [vmem:[#allocation4 + $0x70] sm:$0xff] }
  0x4e   : > { %645 = vmatpush3.bf16.msra.mxu0 %v644_v14  ;;  %667 = vmatprep.subr.bf16.mxu1 %v797_v0  ;;  %v680_v47 = vpack.c.bf16 %v362_v46, %v361_v45  ;;  %v364_v49 = vld [vmem:[#allocation4 + $0x78] sm:$0xff]  ;;  %v529_v51 = vld [vmem:[%s954_s2] ss:$0 sm:$0xff] }
  0x4f   : > { %646 = vmatprep.subr.bf16.mxu0 %v797_v0  ;;  %v683_v50 = vpack.c.bf16 %v364_v49, %v363_v48  ;;  %v530_v60 = vld [vmem:[%s956_s4] ss:$0 sm:$0xff] }
  0x51   : > { %669 = vmatpush3.bf16.msra.mxu1 %v668_v24 }
  0x52   : > { %648 = vmatpush3.bf16.msra.mxu0 %v647_v21  ;;  %670 = vmatprep.subr.bf16.mxu1 %v797_v0 }
  0x53   : > { %649 = vmatprep.subr.bf16.mxu0 %v797_v0 }
  0x55   : > { %672 = vmatpush3.bf16.msra.mxu1 %v671_v38 }
  0x56   : > { %651 = vmatpush3.bf16.msra.mxu0 %v650_v25  ;;  %673 = vmatprep.subr.bf16.mxu1 %v797_v0 }
  0x57   : > { %652 = vmatprep.subr.bf16.mxu0 %v797_v0 }
  0x59   : > { %675 = vmatpush3.bf16.msra.mxu1 %v674_v41 }
  0x5a   : > { %654 = vmatpush3.bf16.msra.mxu0 %v653_v28  ;;  %676 = vmatprep.subr.bf16.mxu1 %v797_v0 }
  0x5b   : > { %655 = vmatprep.subr.bf16.mxu0 %v797_v0 }
  0x5d   : > { %678 = vmatpush3.bf16.msra.mxu1 %v677_v44 }
  0x5e   : > { %657 = vmatpush3.bf16.msra.mxu0 %v656_v31  ;;  %679 = vmatprep.subr.bf16.mxu1 %v797_v0 }
  0x5f   : > { %658 = vmatprep.subr.bf16.mxu0 %v797_v0 }
  0x61   : > { %681 = vmatpush3.bf16.msra.mxu1 %v680_v47 }
  0x62   : > { %660 = vmatpush3.bf16.msra.mxu0 %v659_v34  ;;  %682 = vmatprep.subr.bf16.mxu1 %v797_v0 }
  0x65   : > { %600 = vmatmul.mubr.f32.vlgmr.msra.gmra.mrb[0].mxu0 %v250_v35  ;;  %684 = vmatpush3.bf16.msra.mxu1 %v683_v50 }
 0x138   : > { %v340_v52 = vpop.f32.mrb[0].mxu0 }
 0x139   : > { %v341_v53 = vadd.f32 %v529_v51, %v340_v52  ;;  %v601_v54 = vpop.f32.mrb[1].mxu0 }
 0x13b   : > { %v345_v55 = vmul.f32 0.70710677, %v341_v53  ;;  %v344_v57 = vmul.f32 0.5, %v341_v53 }
 0x13d   : > { %719 = verf.f32 %v345_v55 }
 0x147   : > { %v720_v56 = vpop.eup %719 }
 0x148   : > { %v347_v58 = vadd.f32 1.0, %v720_v56 }
 0x14a   : > { %v348_v59 = vmul.f32 %v347_v58, %v344_v57 }
 0x14c   : > { %635 = vmatmul.mubr.f32.vlgmr.msra.gmra.mrb[0].mxu1 %v348_v59 }
 0x21f   : > { %v438_v61 = vpop.f32.mrb[0].mxu1 }
 0x220   : > { %v439_v62 = vadd.f32 %v530_v60, %v438_v61  ;;  %v636_v63 = vpop.f32.mrb[1].mxu1 }
 0x222   : > { %442 = vst [vmem:[%s249_s10] sm:$0xff] %v439_v62 }
 0x223 PF: > { %s17_s18 = sadd.s32 1, %s791_s18  }
 0x224   : > { %p14_p9 = scmp.ge.s32.totalorder %s17_s18, 4  }
 0x226   :  { %16 = sbr.rel (!%p14_p9) target bundleno = 2 (0x2), region = 79 }
 0x22d   :  { %462 = vsyncpa [#allocation3], 1 }
 0x22e   :  { %464 = vsyncpa [#allocation3 + $0x1], 1 }
 0x22f   :  { %465 = vsyncpa [#allocation5], 1 }

</bundles_post_ra>
